<compile_context>
chip_gen: v7x
topology: tpu7x:2x2x1
jax: 0.10.0
libtpu: 0.0.40
codegen_flags: <defaults>
</compile_context>

<pallas_src>
import jax
import jax.numpy as jnp
from jax.experimental import pallas as pl
from jax.experimental.pallas import tpu as pltpu


_MIN_GRID_STEPS = 4           # keep both v7x TensorCores fed (harmless on v5e/v6e)
_VMEM_BUDGET = 22 * 2 ** 20   # target working set for pipelined buffers
_VMEM_LIMIT = 32 * 2 ** 20    # explicit scoped-VMEM limit; safe on v5e/v6e/v7x


def _sparse_conv_kernel(xg_ref, w_ref, b_ref, o_ref):
    """Grid = (N_tiles,).  One fused-tap GEMM per tile, bias folded in f32 epilogue."""
    # xg_ref: (tile_n, K3*C_in) bf16   w_ref: (K3*C_in, C_out) bf16   b_ref: (1, C_out) f32
    acc = jnp.dot(xg_ref[...], w_ref[...], preferred_element_type=jnp.float32)
    o_ref[...] = (acc + b_ref[...]).astype(o_ref.dtype)


def _kernel_offsets(kernel_size, dilation):
    """(K^3, 3) int32 offsets, z-fastest, scaled by dilation."""
    r = jnp.arange(kernel_size, dtype=jnp.int32) - (kernel_size // 2)
    dx, dy, dz = jnp.meshgrid(r, r, r, indexing="ij")          # z fastest when raveled
    return jnp.stack([dx.ravel(), dy.ravel(), dz.ravel()], axis=-1) * dilation


def _build_neighbor_map(coords, *, kernel_size, dilation, grid_reso):
    """torchsparse-style kernel map built with a sorted-key binary search.

    nbr[i, d] = row index of the active voxel at coords[i] + offset[d]*dilation,
    or N (the zero row) if that voxel is not active / out of bounds.
    Assumes coords are unique, in [0, grid_reso)^3, and batch*R^3 < 2^31.
    """
    N = coords.shape[0]
    R = grid_reso

    key = ((coords[:, 0] * R + coords[:, 1]) * R + coords[:, 2]) * R + coords[:, 3]
    order = jnp.argsort(key).astype(jnp.int32)
    skey = key[order]

    offs = _kernel_offsets(kernel_size, dilation)               # (K3, 3)
    tgt = coords[:, None, 1:4] + offs[None, :, :]               # (N, K3, 3)
    in_bounds = jnp.all((tgt >= 0) & (tgt < R), axis=-1)        # (N, K3)
    tgt_c = jnp.clip(tgt, 0, R - 1)
    qkey = (((coords[:, 0:1] * R + tgt_c[..., 0]) * R
             + tgt_c[..., 1]) * R + tgt_c[..., 2])              # (N, K3)

    pos = jnp.searchsorted(skey, qkey)                          # (N, K3), in [0, N]
    pos_c = jnp.minimum(pos, N - 1)
    found = in_bounds & (skey[pos_c] == qkey)
    return jnp.where(found, order[pos_c], jnp.int32(N))         # N -> zero row


def _gather_neighbors_fused(feats, nbr, compute_dtype):
    """(N, K^3*C_in) gathered slab, tap index as the slow factor of the fused axis
    (matches weight.reshape(K3*C_in, C_out)).  Cast to compute_dtype BEFORE the
    gather so the 27x slab never exists in f32."""
    N, C_in = feats.shape
    K3 = nbr.shape[1]
    feats_z = jnp.concatenate(
        [feats.astype(compute_dtype), jnp.zeros((1, C_in), compute_dtype)], axis=0)
    return feats_z[nbr].reshape(N, K3 * C_in)


def sparse_conv3d(feats, coords, weight, bias, *, kernel_size, stride=1,
                  dilation=1, grid_reso=8, batch_size=1, tile_n=2048,
                  compute_dtype=jnp.bfloat16):
    assert stride == 1, "only the stride=1 (submanifold) path is implemented"
    # TODO(synk): stride>1 would generate a new (downsampled) output coordinate set;
    #             not implemented here.
    N, C_in = feats.shape
    K3, _, C_out = weight.shape
    assert K3 == kernel_size ** 3
    assert batch_size * grid_reso ** 3 < 2 ** 31, "coordinate key would overflow int32"
    kc = K3 * C_in

    # Kernel map (in production: build once per indice_key and reuse across layers).
    nbr = _build_neighbor_map(coords, kernel_size=kernel_size, dilation=dilation,
                              grid_reso=grid_reso)

    # TODO(synk): moving this K^3 row gather inside the Pallas kernel (feats VMEM-resident,
    #             nbr streamed) would cut the dominant HBM stream a further ~3.5-14x, but
    #             Mosaic has no efficient vector-index row gather over a large VMEM table
    #             (jnp.take lowers to per-vreg select chains / is rejected; per-row DMA is
    #             descriptor-bound at C_in*2-byte rows), so the gather stays in XLA in bf16.
    xg = _gather_neighbors_fused(feats, nbr, compute_dtype)          # (N, kc) bf16

    # ---- tile selection -----------------------------------------------------
    # Per tile row: 2 double-buffered bf16 activation rows + 2 f32 output rows.
    itm = jnp.dtype(compute_dtype).itemsize
    row_bytes = 2 * kc * itm + 2 * C_out * 4
    w_bytes = 2 * kc * C_out * itm                                   # resident weight bufs
    max_rows = max(128, ((_VMEM_BUDGET - w_bytes) // row_bytes) // 128 * 128)
    n_rows_128 = pl.cdiv(N, 128) * 128
    # Enough grid steps to shard across v7x's two TensorCores (when N allows it).
    split_rows = max(128, (n_rows_128 // _MIN_GRID_STEPS) // 128 * 128)
    tile_n = max(128, min(tile_n, max_rows, split_rows, n_rows_128))

    n_pad = (-N) % tile_n
    n_total = N + n_pad

    xg = jnp.pad(xg, ((0, n_pad), (0, 0)))                           # bf16 zero rows
    w_fused = weight.reshape(kc, C_out).astype(compute_dtype)
    bias2d = bias.reshape(1, C_out).astype(jnp.float32)

    cost = pl.CostEstimate(
        flops=2 * n_total * kc * C_out,
        transcendentals=0,
        bytes_accessed=int(n_total * kc * itm + kc * C_out * itm
                           + C_out * 4 + n_total * C_out * 4))

    out = pl.pallas_call(
        _sparse_conv_kernel,
        out_shape=jax.ShapeDtypeStruct((n_total, C_out), feats.dtype),
        grid_spec=pltpu.PrefetchScalarGridSpec(
            num_scalar_prefetch=0,
            grid=(n_total // tile_n,),
            in_specs=[
                # Streamed activations (default depth-2 double buffering; sweep
                # pipeline_mode=pl.Buffered(3) if a profile shows exposed DMA).
                pl.BlockSpec((tile_n, kc), lambda i: (i, 0)),
                pl.BlockSpec((kc, C_out), lambda i: (0, 0)),    # VMEM-resident weight
                pl.BlockSpec((1, C_out), lambda i: (0, 0)),     # VMEM-resident bias
            ],
            out_specs=pl.BlockSpec((tile_n, C_out), lambda i: (i, 0)),
        ),
        compiler_params=pltpu.CompilerParams(
            dimension_semantics=("parallel",),
            vmem_limit_bytes=_VMEM_LIMIT),
        cost_estimate=cost,
    )(xg, w_fused, bias2d)
    # TODO(synk): lane-dense output packing ((tile_n//8, 8*C_out) slab) for C_out<128 is
    #             deferred -- it needs an in-kernel sublane->lane relayout whose Mosaic
    #             reshape lowering must be bundle-verified; output is ~1/8 of HBM traffic.

    return out[:N]   # padded rows are bias-only and sliced off


def _reference_conv(feats, coords, weight, bias, *, kernel_size, dilation,
                    grid_reso, batch_size, compute_dtype=jnp.bfloat16):
    """Independent pure-JAX reference using a dense lookup volume (cross-checks the
    searchsorted kernel map).  Same bf16 input rounding, f32 accumulation."""
    N, C_in = feats.shape
    K3 = kernel_size ** 3
    dense = jnp.full((batch_size, grid_reso, grid_reso, grid_reso), N, jnp.int32)
    dense = dense.at[coords[:, 0], coords[:, 1], coords[:, 2], coords[:, 3]].set(
        jnp.arange(N, dtype=jnp.int32))
    offs = _kernel_offsets(kernel_size, dilation)
    tgt = coords[:, None, 1:4] + offs[None, :, :]
    in_bounds = jnp.all((tgt >= 0) & (tgt < grid_reso), axis=-1)
    tgt_c = jnp.clip(tgt, 0, grid_reso - 1)
    b_idx = jnp.broadcast_to(coords[:, 0:1], (N, K3))
    nbr = dense[b_idx, tgt_c[..., 0], tgt_c[..., 1], tgt_c[..., 2]]
    nbr = jnp.where(in_bounds, nbr, N)
    feats_z = jnp.concatenate(
        [feats.astype(compute_dtype), jnp.zeros((1, C_in), compute_dtype)], axis=0)
    xg = feats_z[nbr].reshape(N, K3 * C_in).astype(jnp.float32)
    w = weight.reshape(K3 * C_in, -1).astype(compute_dtype).astype(jnp.float32)
    return xg @ w + bias[None, :]


if __name__ == "__main__":
    key = jax.random.PRNGKey(0)

    # Small synthetic sparse tensor: batch=2, 8^3 grid, 256 active voxels per batch
    # (N=512 so the kernel exercises a multi-step "parallel" grid).
    B, R = 2, 8
    C_in, C_out, K = 8, 16, 3
    n_per_batch = 256

    coords_list = []
    for b in range(B):
        kb = jax.random.fold_in(key, b)
        perm = jax.random.permutation(kb, R ** 3)[:n_per_batch]
        x = perm // (R * R)
        y = (perm // R) % R
        z = perm % R
        coords_list.append(jnp.stack([jnp.full_like(x, b), x, y, z], axis=-1))
    coords = jnp.concatenate(coords_list, axis=0).astype(jnp.int32)   # (N, 4)
    N = coords.shape[0]

    kf, kw, kbias = jax.random.split(jax.random.fold_in(key, 100), 3)
    feats = jax.random.normal(kf, (N, C_in), jnp.float32)             # (N, C_in)
    K3 = K ** 3
    # Deterministic kaiming-like init matching torchsparse Conv3d weight layout
    # (K^3, C_in, C_out) and bias (C_out,).
    weight = jax.random.normal(kw, (K3, C_in, C_out), jnp.float32) / jnp.sqrt(C_in * K3)
    bias = jax.random.uniform(kbias, (C_out,), jnp.float32, -0.1, 0.1)

    out = sparse_conv3d(feats, coords, weight, bias, kernel_size=K,
                        stride=1, dilation=1, grid_reso=R, batch_size=B)
    out = jax.block_until_ready(out)

    ref = _reference_conv(feats, coords, weight, bias, kernel_size=K, dilation=1,
                          grid_reso=R, batch_size=B)

    assert out.shape == (N, C_out)
    err = float(jnp.max(jnp.abs(out - ref)))
    assert jnp.allclose(out, ref, atol=1e-3, rtol=1e-3), f"max abs err {err}"

    print("KERNEL_OK")
</pallas_src>

<mosaic_0001>
module attributes {stable_mosaic.version = 11 : i64} {
  func.func @_sparse_conv_kernel(%arg0: i32, %arg1: memref<128x216xbf16, #tpu.memory_space<vmem>>, %arg2: memref<216x16xbf16, #tpu.memory_space<vmem>>, %arg3: memref<1x16xf32, #tpu.memory_space<vmem>>, %arg4: memref<128x16xf32, #tpu.memory_space<vmem>>) attributes {dimension_semantics = [#tpu.dimension_semantics<parallel>], iteration_bounds = array<i64: 4>, scalar_prefetch = 0 : i64, scratch_operands = 0 : i64, tpu.core_type = #tpu.core_type<tc>, window_params = [{transform_indices = @transform_0, window_bounds = array<i64: 128, 216>}, {pipeline_mode = #tpu.pipeline_mode<synchronous>, transform_indices = @transform_1, window_bounds = array<i64: 216, 16>}, {pipeline_mode = #tpu.pipeline_mode<synchronous>, transform_indices = @transform_2, window_bounds = array<i64: 1, 16>}, {transform_indices = @transform_3, window_bounds = array<i64: 128, 16>}]} {
    %c0 = arith.constant 0 : index
    %c0_0 = arith.constant 0 : index
    %0 = vector.load %arg1[%c0, %c0_0] : memref<128x216xbf16, #tpu.memory_space<vmem>>, vector<128x216xbf16>
    %c0_1 = arith.constant 0 : index
    %c0_2 = arith.constant 0 : index
    %1 = vector.load %arg2[%c0_1, %c0_2] : memref<216x16xbf16, #tpu.memory_space<vmem>>, vector<216x16xbf16>
    %cst = arith.constant dense<0.000000e+00> : vector<128x16xf32>
    %2 = tpu.matmul %0, %1, %cst {dimension_numbers = #tpu.dot_dimension_numbers<[1], [0], [0], [1], [0, 0, 1, 1], [], []>} : vector<128x216xbf16>, vector<216x16xbf16>, vector<128x16xf32> -> vector<128x16xf32>
    %c0_3 = arith.constant 0 : index
    %c0_4 = arith.constant 0 : index
    %3 = vector.load %arg3[%c0_3, %c0_4] : memref<1x16xf32, #tpu.memory_space<vmem>>, vector<1x16xf32>
    %4 = vector.broadcast %3 : vector<1x16xf32> to vector<128x16xf32>
    %5 = arith.addf %2, %4 : vector<128x16xf32>
    %c0_5 = arith.constant 0 : index
    %c0_6 = arith.constant 0 : index
    %6 = vector.load %arg4[%c0_5, %c0_6] : memref<128x16xf32, #tpu.memory_space<vmem>>, vector<128x16xf32>
    tpu.vector_store %arg4[%c0_5, %c0_6], %5 {strides = array<i32>} : memref<128x16xf32, #tpu.memory_space<vmem>>, vector<128x16xf32>,
    return
  }
  func.func @transform_0(%arg0: i32) -> (i32, i32) {
    %c0_i32 = arith.constant 0 : i32
    %c0_i32_0 = arith.constant 0 : i32
    return %arg0, %c0_i32 : i32, i32
  }
  func.func @transform_1(%arg0: i32) -> (i32, i32) {
    %c0_i32 = arith.constant 0 : i32
    %c0_i32_0 = arith.constant 0 : i32
    %c0_i32_1 = arith.constant 0 : i32
    return %c0_i32, %c0_i32_0 : i32, i32
  }
  func.func @transform_2(%arg0: i32) -> (i32, i32) {
    %c0_i32 = arith.constant 0 : i32
    %c0_i32_0 = arith.constant 0 : i32
    %c0_i32_1 = arith.constant 0 : i32
    return %c0_i32, %c0_i32_0 : i32, i32
  }
  func.func @transform_3(%arg0: i32) -> (i32, i32) {
    %c0_i32 = arith.constant 0 : i32
    %c0_i32_0 = arith.constant 0 : i32
    return %arg0, %c0_i32 : i32, i32
  }
}

</mosaic_0001>

<bundles_post_ra>
// kernel: tpu_custom_call.1
= control target key start
LH: loop header
LB: loop body
LE: loop exit
PB: predicated region body
PF: predicated region fallthrough
CT: control target
= control target key end

     0   :  { %s736_s12 = smov 0   ;;  %s893_s0 = inlined_call_operand.vmem [shape: bf16[512,216], index: 0, kind: input, shape index: {}]   ;;  %s894_s1 = inlined_call_operand.vmem [shape: bf16[216,16], index: 1, kind: input, shape index: {}]   ;;  %s895_s2 = inlined_call_operand.vmem [shape: f32[1,16], index: 2, kind: input, shape index: {}]   ;;  %s896_s3 = inlined_call_operand.vmem [shape: f32[512,16], index: 3, kind: output, shape index: {}]  }
   0x1 LB: > { %s580_s13 = sadd.s32 4294967295, %s713_s12   ;;  %p584_p0 = scmp.ge.s32.totalorder %s713_s12, 1  ;;  %s713_s12 = sphi %s736_s12, %s13_s12  }
   0x2   : > { %p139_p1 = scmp.lt.s32.totalorder %s713_s12, 5 }
   0x4   : > { %p140_p2 = pnand %p584_p0, %p139_p1 }
   0x5   : > { %v669_v0 = vld [vmem:[%s894_s1] sm:$0xff] (!%p140_p2)   ;;  %v715_v1 = vmov (!%p140_p2), 0   ;;  %v670_v2 = vld [vmem:[%s894_s1 + $0x8] sm:$0xff] (!%p140_p2)   ;;  %s585_s18 = sshll.u32 (!%p140_p2), %s580_s13, 4  ;;  %v671_v3 = vld [vmem:[%s894_s1 + $0x10] sm:$0xff] (!%p140_p2)   ;;  %vm381_vm0 = vcmask (!%p140_p2), 719872  }
   0x6   : > { %143 = sbr.rel (%p140_p2) target bundleno = 303 (0x12f), region = 32  ;;  %410 = vmatprep.subr.bf16.mxu0 (!%p140_p2), %v715_v1  ;;  %632 = vmatprep.subr.bf16.mxu1 (!%p140_p2), %v715_v1  ;;  %p165_p3 = scmp.lt.s32.totalorder (!%p140_p2), %s585_s18, 63  ;;  %v672_v4 = vld [vmem:[%s894_s1 + $0x18] sm:$0xff] (!%p140_p2)   ;;  %v673_v5 = vld [vmem:[%s894_s1 + $0x20] sm:$0xff] (!%p140_p2)   ;;  %v674_v8 = vld [vmem:[%s894_s1 + $0x28] sm:$0xff] (!%p140_p2)   ;;  %vm406_vm1 = vcmask (!%p140_p2), 1043456  }
   0x7   : > { %411 = vmatpush1.bf16.msra.mxu0 (!%p140_p2), %v669_v0  ;;  %646 = vmatpush1.bf16.msra.mxu1 (!%p140_p2), %v669_v0  ;;  %v675_v9 = vld [vmem:[%s894_s1 + $0x30] sm:$0xff] (!%p140_p2)   ;;  %v676_v10 = vld [vmem:[%s894_s1 + $0x38] sm:$0xff] (!%p140_p2)   ;;  %v677_v11 = vld [vmem:[%s894_s1 + $0x40] sm:$0xff] (!%p140_p2)   ;;  %vm507_vm2 = vcmask (!%p140_p2), 130048  }
   0x8   : > { %412 = vmatprep.subr.bf16.mxu0 (!%p140_p2), %v715_v1  ;;  %633 = vmatprep.subr.bf16.mxu1 (!%p140_p2), %v715_v1  ;;  %v678_v12 = vld [vmem:[%s894_s1 + $0x48] sm:$0xff] (!%p140_p2)   ;;  %v679_v13 = vld [vmem:[%s894_s1 + $0x50] sm:$0xff] (!%p140_p2)   ;;  %v680_v14 = vld [vmem:[%s894_s1 + $0x58] sm:$0xff] (!%p140_p2)  }
   0x9   : > { %v681_v15 = vld [vmem:[%s894_s1 + $0x60] sm:$0xff] (!%p140_p2)   ;;  %v682_v16 = vld [vmem:[%s894_s1 + $0x68] ss:$0 sps:$4 sm:$0xff] (!%p140_p2)  }
   0xa   : > { %v408_v17 = vsel (!%p140_p2), %vm406_vm1, %v682_v16, 0  ;;  %v590_v32 = vld [vmem:[%s895_s2] ss:$0 sm:$0xff] (!%p140_p2) }
   0xb   : > { %413 = vmatpush1.bf16.msra.mxu0 (!%p140_p2), %v670_v2  ;;  %647 = vmatpush1.bf16.msra.mxu1 (!%p140_p2), %v670_v2 }
   0xc   : > { %414 = vmatprep.subr.bf16.mxu0 (!%p140_p2), %v715_v1  ;;  %634 = vmatprep.subr.bf16.mxu1 (!%p140_p2), %v715_v1 }
   0xd   : > { %s898_s18 = smov (!%p165_p3, %s585_s18), 63 }
   0xe   : > { %s631_s21 = sshll.u32 %s898_s18, 3 }
   0xf   : > { %415 = vmatpush1.bf16.msra.mxu0 %v671_v3  ;;  %648 = vmatpush1.bf16.msra.mxu1 %v671_v3  ;;  %s772_s26 = scalar_lea.vmem %s893_s0, %s631_s21  ;;  %s856_s28 = scalar_lea.vmem %s896_s3, %s631_s21 }
  0x10   : > { %416 = vmatprep.subr.bf16.mxu0 %v715_v1  ;;  %635 = vmatprep.subr.bf16.mxu1 %v715_v1  ;;  %v685_v6 = vld [vmem:[%s772_s26 + $0x4] ss:$8 sps:$4 sm:$0xff]   ;;  %v683_v18 = vld [vmem:[%s772_s26] ss:$8 sps:$4 sm:$0xff]   ;;  %v689_v20 = vld [vmem:[%s772_s26 + $0x14] ss:$8 sps:$4 sm:$0xff]  }
  0x11   : > { %621 = vmatprep.mubr.msk.bf16.mxu0 %vm381_vm0, %v685_v6  ;;  %v688_v7 = vld [vmem:[%s772_s26 + $0x44] ss:$8 sps:$4 sm:$0xff]   ;;  %v686_v19 = vld [vmem:[%s772_s26 + $0x40] ss:$8 sps:$4 sm:$0xff]   ;;  %v691_v21 = vld [vmem:[%s772_s26 + $0x54] ss:$8 sps:$4 sm:$0xff]  }
  0x12   : > { %625 = vmatprep.mubr.msk.bf16.mxu1 %vm381_vm0, %v688_v7  ;;  %v693_v22 = vld [vmem:[%s772_s26 + $0x10] ss:$8 sps:$4 sm:$0xff]   ;;  %v695_v24 = vld [vmem:[%s772_s26 + $0x24] ss:$8 sps:$4 sm:$0xff]   ;;  %v699_v26 = vld [vmem:[%s772_s26 + $0x20] ss:$8 sps:$4 sm:$0xff]  }
  0x13   : > { %417 = vmatpush1.bf16.msra.mxu0 %v672_v4  ;;  %649 = vmatpush1.bf16.msra.mxu1 %v672_v4  ;;  %v694_v23 = vld [vmem:[%s772_s26 + $0x50] ss:$8 sps:$4 sm:$0xff]   ;;  %v697_v25 = vld [vmem:[%s772_s26 + $0x64] ss:$8 sps:$4 sm:$0xff]   ;;  %v700_v27 = vld [vmem:[%s772_s26 + $0x60] ss:$8 sps:$4 sm:$0xff]  }
  0x14   : > { %418 = vmatprep.subr.bf16.mxu0 %v715_v1  ;;  %636 = vmatprep.subr.bf16.mxu1 %v715_v1  ;;  %v701_v28 = vld [vmem:[%s772_s26 + $0x34] ss:$8 sps:$4 sm:$0xff]   ;;  %v705_v30 = vld [vmem:[%s772_s26 + $0x30] ss:$8 sps:$4 sm:$0xff]  }
  0x15   : > { %v703_v29 = vld [vmem:[%s772_s26 + $0x74] ss:$8 sps:$4 sm:$0xff]   ;;  %v706_v31 = vld [vmem:[%s772_s26 + $0x70] ss:$8 sps:$4 sm:$0xff]  }
  0x17   : > { %419 = vmatpush1.bf16.msra.mxu0 %v673_v5  ;;  %650 = vmatpush1.bf16.msra.mxu1 %v673_v5 }
  0x18   : > { %420 = vmatprep.subr.bf16.mxu0 %v715_v1  ;;  %637 = vmatprep.subr.bf16.mxu1 %v715_v1 }
  0x1b   : > { %421 = vmatpush1.bf16.msra.mxu0 %v674_v8  ;;  %651 = vmatpush1.bf16.msra.mxu1 %v674_v8 }
  0x1c   : > { %422 = vmatprep.subr.bf16.mxu0 %v715_v1  ;;  %638 = vmatprep.subr.bf16.mxu1 %v715_v1 }
  0x1f   : > { %423 = vmatpush1.bf16.msra.mxu0 %v675_v9  ;;  %652 = vmatpush1.bf16.msra.mxu1 %v675_v9 }
  0x20   : > { %424 = vmatprep.subr.bf16.mxu0 %v715_v1  ;;  %639 = vmatprep.subr.bf16.mxu1 %v715_v1 }
  0x23   : > { %425 = vmatpush1.bf16.msra.mxu0 %v676_v10  ;;  %653 = vmatpush1.bf16.msra.mxu1 %v676_v10 }
  0x24   : > { %426 = vmatprep.subr.bf16.mxu0 %v715_v1  ;;  %640 = vmatprep.subr.bf16.mxu1 %v715_v1 }
  0x27   : > { %427 = vmatpush1.bf16.msra.mxu0 %v677_v11  ;;  %654 = vmatpush1.bf16.msra.mxu1 %v677_v11 }
  0x28   : > { %428 = vmatprep.subr.bf16.mxu0 %v715_v1  ;;  %641 = vmatprep.subr.bf16.mxu1 %v715_v1 }
  0x2b   : > { %429 = vmatpush1.bf16.msra.mxu0 %v678_v12  ;;  %655 = vmatpush1.bf16.msra.mxu1 %v678_v12 }
  0x2c   : > { %430 = vmatprep.subr.bf16.mxu0 %v715_v1  ;;  %642 = vmatprep.subr.bf16.mxu1 %v715_v1 }
  0x2f   : > { %431 = vmatpush1.bf16.msra.mxu0 %v679_v13  ;;  %656 = vmatpush1.bf16.msra.mxu1 %v679_v13 }
  0x30   : > { %432 = vmatprep.subr.bf16.mxu0 %v715_v1  ;;  %643 = vmatprep.subr.bf16.mxu1 %v715_v1 }
  0x33   : > { %433 = vmatpush1.bf16.msra.mxu0 %v680_v14  ;;  %657 = vmatpush1.bf16.msra.mxu1 %v680_v14 }
  0x34   : > { %434 = vmatprep.subr.bf16.mxu0 %v715_v1  ;;  %644 = vmatprep.subr.bf16.mxu1 %v715_v1 }
  0x37   : > { %435 = vmatpush1.bf16.msra.mxu0 %v681_v15  ;;  %658 = vmatpush1.bf16.msra.mxu1 %v681_v15 }
  0x38   : > { %436 = vmatprep.subr.bf16.mxu0 %v715_v1  ;;  %645 = vmatprep.subr.bf16.mxu1 %v715_v1 }
  0x3b   : > { %437 = vmatpush1.bf16.msra.mxu0 %v408_v17  ;;  %659 = vmatpush1.bf16.msra.mxu1 %v408_v17 }
  0x3e   : > { %443 = vmatmul.mubr.bf16.vlgmr.msra.gmra.mrb[0].mxu0 %v683_v18  ;;  %475 = vmatmul.mubr.bf16.vlgmr.msra.gmra.mrb[0].mxu1 %v686_v19 }
  0x3f   : > { %622 = vmatprep.mubr.msk.bf16.mxu0 %vm381_vm0, %v689_v20  ;;  %626 = vmatprep.mubr.msk.bf16.mxu1 %vm381_vm0, %v691_v21 }
  0x46   : > { %451 = vmatmul.mubr.bf16.gmra.mrb[4].mxu0 %v693_v22  ;;  %483 = vmatmul.mubr.bf16.gmra.mrb[4].mxu1 %v694_v23 }
  0x47   : > { %623 = vmatprep.mubr.msk.bf16.mxu0 %vm381_vm0, %v695_v24  ;;  %627 = vmatprep.mubr.msk.bf16.mxu1 %vm381_vm0, %v697_v25 }
  0x4e   : > { %459 = vmatmul.mubr.bf16.gmra.mrb[8].mxu0 %v699_v26  ;;  %491 = vmatmul.mubr.bf16.gmra.mrb[8].mxu1 %v700_v27 }
  0x4f   : > { %624 = vmatprep.mubr.msk.bf16.mxu0 %vm381_vm0, %v701_v28  ;;  %628 = vmatprep.mubr.msk.bf16.mxu1 %vm381_vm0, %v703_v29 }
  0x56   : > { %467 = vmatmul.mubr.bf16.gmra.mrb[12].mxu0 %v705_v30  ;;  %499 = vmatmul.mubr.bf16.gmra.mrb[12].mxu1 %v706_v31 }
 0x111   : > { %v444_v33 = vpop.f32.mrb[0].mxu0  ;;  %v476_v34 = vpop.f32.mrb[0].mxu1 }
 0x112   : > { %v445_v35 = vadd.f32 %v590_v32, %v444_v33  ;;  %v477_v36 = vadd.f32 %v590_v32, %v476_v34  ;;  %v446_v37 = vpop.f32.mrb[1].mxu0  ;;  %v478_v38 = vpop.f32.mrb[1].mxu1 }
 0x113   : > { %v447_v39 = vpop.f32.mrb[2].mxu0  ;;  %v479_v40 = vpop.f32.mrb[2].mxu1 }
 0x114   : > { %508 = vst.msk [vmem:[%s856_s28] sm:$0xff] %vm507_vm2, %v445_v35  ;;  %516 = vst.msk [vmem:[%s856_s28 + $0x40] sm:$0xff] %vm507_vm2, %v477_v36  ;;  %v448_v41 = vadd.f32 %v590_v32, %v447_v39  ;;  %v480_v42 = vadd.f32 %v590_v32, %v479_v40  ;;  %v449_v43 = vpop.f32.mrb[3].mxu0  ;;  %v481_v44 = vpop.f32.mrb[3].mxu1 }
 0x116   : > { %509 = vst.msk [vmem:[%s856_s28 + $0x8] sm:$0xff] %vm507_vm2, %v448_v41  ;;  %517 = vst.msk [vmem:[%s856_s28 + $0x48] sm:$0xff] %vm507_vm2, %v480_v42 }
 0x119   : > { %v452_v45 = vpop.f32.mrb[4].mxu0  ;;  %v484_v46 = vpop.f32.mrb[4].mxu1 }
 0x11a   : > { %v453_v47 = vadd.f32 %v590_v32, %v452_v45  ;;  %v485_v48 = vadd.f32 %v590_v32, %v484_v46  ;;  %v454_v49 = vpop.f32.mrb[5].mxu0  ;;  %v486_v50 = vpop.f32.mrb[5].mxu1 }
 0x11b   : > { %v455_v51 = vpop.f32.mrb[6].mxu0  ;;  %v487_v52 = vpop.f32.mrb[6].mxu1 }
 0x11c   : > { %510 = vst.msk [vmem:[%s856_s28 + $0x10] sm:$0xff] %vm507_vm2, %v453_v47  ;;  %518 = vst.msk [vmem:[%s856_s28 + $0x50] sm:$0xff] %vm507_vm2, %v485_v48  ;;  %v456_v53 = vadd.f32 %v590_v32, %v455_v51  ;;  %v488_v54 = vadd.f32 %v590_v32, %v487_v52  ;;  %v457_v55 = vpop.f32.mrb[7].mxu0  ;;  %v489_v56 = vpop.f32.mrb[7].mxu1 }
 0x11e   : > { %511 = vst.msk [vmem:[%s856_s28 + $0x18] sm:$0xff] %vm507_vm2, %v456_v53  ;;  %519 = vst.msk [vmem:[%s856_s28 + $0x58] sm:$0xff] %vm507_vm2, %v488_v54 }
 0x121   : > { %v460_v57 = vpop.f32.mrb[8].mxu0  ;;  %v492_v58 = vpop.f32.mrb[8].mxu1 }
 0x122   : > { %v461_v59 = vadd.f32 %v590_v32, %v460_v57  ;;  %v493_v60 = vadd.f32 %v590_v32, %v492_v58  ;;  %v462_v61 = vpop.f32.mrb[9].mxu0  ;;  %v494_v62 = vpop.f32.mrb[9].mxu1 }
 0x123   : > { %v463_v63 = vpop.f32.mrb[10].mxu0  ;;  %v495_v0 = vpop.f32.mrb[10].mxu1 }
 0x124   : > { %512 = vst.msk [vmem:[%s856_s28 + $0x20] sm:$0xff] %vm507_vm2, %v461_v59  ;;  %520 = vst.msk [vmem:[%s856_s28 + $0x60] sm:$0xff] %vm507_vm2, %v493_v60  ;;  %v464_v1 = vadd.f32 %v590_v32, %v463_v63  ;;  %v496_v2 = vadd.f32 %v590_v32, %v495_v0  ;;  %v465_v3 = vpop.f32.mrb[11].mxu0  ;;  %v497_v4 = vpop.f32.mrb[11].mxu1 }
 0x126   : > { %513 = vst.msk [vmem:[%s856_s28 + $0x28] sm:$0xff] %vm507_vm2, %v464_v1  ;;  %521 = vst.msk [vmem:[%s856_s28 + $0x68] sm:$0xff] %vm507_vm2, %v496_v2 }
 0x129   : > { %v468_v5 = vpop.f32.mrb[12].mxu0  ;;  %v500_v6 = vpop.f32.mrb[12].mxu1 }
 0x12a   : > { %v469_v7 = vadd.f32 %v590_v32, %v468_v5  ;;  %v501_v8 = vadd.f32 %v590_v32, %v500_v6  ;;  %v470_v9 = vpop.f32.mrb[13].mxu0  ;;  %v502_v10 = vpop.f32.mrb[13].mxu1 }
 0x12b   : > { %v471_v11 = vpop.f32.mrb[14].mxu0  ;;  %v503_v12 = vpop.f32.mrb[14].mxu1 }
 0x12c   : > { %514 = vst.msk [vmem:[%s856_s28 + $0x30] sm:$0xff] %vm507_vm2, %v469_v7  ;;  %522 = vst.msk [vmem:[%s856_s28 + $0x70] sm:$0xff] %vm507_vm2, %v501_v8  ;;  %v472_v13 = vadd.f32 %v590_v32, %v471_v11  ;;  %v504_v14 = vadd.f32 %v590_v32, %v503_v12  ;;  %v473_v15 = vpop.f32.mrb[15].mxu0  ;;  %v505_v16 = vpop.f32.mrb[15].mxu1 }
 0x12e   : > { %515 = vst.msk [vmem:[%s856_s28 + $0x38] sm:$0xff] %vm507_vm2, %v472_v13  ;;  %523 = vst.msk [vmem:[%s856_s28 + $0x78] sm:$0xff] %vm507_vm2, %v504_v14 }
 0x12f PF: > { %s13_s12 = sadd.s32 1, %s713_s12  }
 0x130   : > { %p10_p4 = scmp.ge.s32.totalorder %s13_s12, 6  }
 0x132   :  { %12 = sbr.rel (!%p10_p4) target bundleno = 1 (0x1), region = 62 }

</bundles_post_ra>
